<compile_context>
chip_gen: v5e
topology: v5e:2x2
jax: 0.10.0
libtpu: 0.0.40
codegen_flags: <defaults>
</compile_context>

<pallas_src>
import functools

import jax
import jax.numpy as jnp
from jax.experimental import pallas as pl
from jax.experimental.pallas import tpu as pltpu


def _vmem_capacity_bytes():
    try:
        cap = int(pltpu.get_tpu_info().vmem_capacity_bytes)
        if cap > 0:
            return cap
    except Exception:
        pass
    return 64 * 1024 * 1024  # conservative: v7x physical VMEM per TensorCore


def _choose_tile_b(B, D, itemsize, vmem_cap, requested=None):
    """Largest sublane-aligned batch tile whose pipelined working set fits VMEM."""
    sub = 8 if itemsize >= 4 else 16          # f32 sublane=8, bf16 packs 16 rows
    if B <= sub:
        return int(B)                         # single full-extent block
    if requested is not None:
        tb = int(requested)
    else:
        budget = int(vmem_cap * 0.8)
        # 6 inputs x 2 pipeline buffers + ~8 tile-sized f32 elementwise temps.
        bytes_per_row = 2 * 6 * D * itemsize + 8 * D * 4
        tb = budget // bytes_per_row
    tb = max(sub, (tb // sub) * sub)
    tb = min(tb, (B // sub) * sub)            # block never exceeds the array extent
    return int(tb)


def _metric_loss_kernel(anc_ref, pos_ref, neg_ref, anci_ref, posi_ref, negi_ref,
                        out_ref, *, margin, batch, tile_b):
    """Each ref is a (tile_b, D) block; out_ref is the (tile_b, 1) per-row loss."""
    i = pl.program_id(0)
    eps = 1e-6                     # torch pairwise_distance default eps
    ro, tau, xi = 0.1, 1.0, 1.0

    def pdist(a_ref, b_ref):
        # ||a - b + eps||_2 along the lane (D) axis, keepdims -> (tile_b, 1)
        d = a_ref[...].astype(jnp.float32) - b_ref[...].astype(jnp.float32) + eps
        return jnp.sqrt(jnp.sum(d * d, axis=-1, keepdims=True))

    d_an = pdist(anc_ref, neg_ref)
    d_ap = pdist(anc_ref, pos_ref)
    d_ai = pdist(anc_ref, anci_ref)
    d_pi = pdist(pos_ref, posi_ref)
    d_ni = pdist(neg_ref, negi_ref)

    # Stable softplus; torch's threshold=20000 linear branch is never taken for
    # realistic inputs, so this matches log1p(exp(z)).
    z = d_ap - d_an + margin
    sp = jnp.maximum(z, 0.0) + jnp.log1p(jnp.exp(-jnp.abs(z)))

    g1 = ro * d_ap
    g2 = tau * sp
    g3 = xi * (d_ai + d_pi + d_ni) / 3.0
    loss = g1 * g1 + g2 * g2 + g3 * g3                     # (tile_b, 1)

    # Zero out-of-range rows of a ragged last block (defensive: the write-back of
    # rows >= batch is clipped anyway, but garbage inputs could hold NaN/Inf).
    row = i * tile_b + jax.lax.broadcasted_iota(jnp.int32, (tile_b, 1), 0)
    out_ref[...] = jnp.where(row < batch, loss, 0.0)


def metric_loss(anc, pos, neg, anc_ideal, pos_ideal, neg_ideal, *,
                margin, tile_b=None):
    """Pallas TPU implementation of MetricLoss.forward. All inputs: (B, D)."""
    B, D = anc.shape
    itemsize = jnp.dtype(anc.dtype).itemsize
    vmem_cap = _vmem_capacity_bytes()
    tile_b = _choose_tile_b(B, D, itemsize, vmem_cap, requested=tile_b)
    num_tiles = pl.cdiv(B, tile_b)

    kernel = functools.partial(_metric_loss_kernel,
                               margin=float(margin), batch=B, tile_b=tile_b)

    in_spec = pl.BlockSpec((tile_b, D), lambda i: (i, 0))
    out_spec = pl.BlockSpec((tile_b, 1), lambda i: (i, 0))

    # Scoped VMEM: double-buffered inputs + elementwise-temp allowance + headroom,
    # clamped under the physical capacity of this generation.
    in_bytes = 6 * tile_b * D * itemsize
    temp_bytes = 8 * tile_b * D * 4
    vmem_limit = 2 * in_bytes + temp_bytes + (4 << 20)
    vmem_limit = int(min(max(vmem_limit, 16 << 20), vmem_cap - (2 << 20)))

    cost = pl.CostEstimate(
        flops=20 * B * D,
        transcendentals=8 * B,
        bytes_accessed=6 * B * D * itemsize + B * 4,
    )

    per_row = pl.pallas_call(
        kernel,
        out_shape=jax.ShapeDtypeStruct((B, 1), jnp.float32),
        grid=(num_tiles,),
        in_specs=[in_spec] * 6,
        out_specs=out_spec,
        compiler_params=pltpu.CompilerParams(
            dimension_semantics=("parallel",),
            vmem_limit_bytes=vmem_limit,
        ),
        cost_estimate=cost,
    )(anc, pos, neg, anc_ideal, pos_ideal, neg_ideal)

    return jnp.mean(per_row)


def metric_loss_ref(anc, pos, neg, anc_ideal, pos_ideal, neg_ideal, *, margin):
    """Pure-JAX reference mirroring the PyTorch module semantics."""
    eps = 1e-6
    ro, tau, xi = 0.1, 1.0, 1.0

    def pdist(a, b):
        d = a.astype(jnp.float32) - b.astype(jnp.float32) + eps
        return jnp.sqrt(jnp.sum(d * d, axis=-1))

    d_an = pdist(anc, neg)
    d_ap = pdist(anc, pos)
    d_ai = pdist(anc, anc_ideal)
    d_pi = pdist(pos, pos_ideal)
    d_ni = pdist(neg, neg_ideal)

    g1 = ro * d_ap
    g2 = tau * jax.nn.softplus(d_ap - d_an + margin)
    g3 = xi * (d_ai + d_pi + d_ni) / 3.0
    return jnp.mean(g1 * g1 + g2 * g2 + g3 * g3)


if __name__ == "__main__":
    # Small but non-trivial: B is NOT a multiple of the forced tile so the ragged
    # last-block path, the row mask and multi-tile execution are all exercised.
    B, D = 20, 128
    margin = 1.0   # MetricLoss(margin=1.0)

    key = jax.random.PRNGKey(0)
    keys = jax.random.split(key, 6)
    anc = jax.random.normal(keys[0], (B, D), dtype=jnp.float32)
    pos = jax.random.normal(keys[1], (B, D), dtype=jnp.float32)
    neg = jax.random.normal(keys[2], (B, D), dtype=jnp.float32)
    anc_ideal = jax.random.normal(keys[3], (B, D), dtype=jnp.float32)
    pos_ideal = jax.random.normal(keys[4], (B, D), dtype=jnp.float32)
    neg_ideal = jax.random.normal(keys[5], (B, D), dtype=jnp.float32)

    # Forced small tile: 3 grid steps, ragged last block.
    out = metric_loss(anc, pos, neg, anc_ideal, pos_ideal, neg_ideal,
                      margin=margin, tile_b=8)
    out = jax.block_until_ready(out)

    # Auto-sized tile (single block) path.
    out_auto = metric_loss(anc, pos, neg, anc_ideal, pos_ideal, neg_ideal,
                           margin=margin)
    out_auto = jax.block_until_ready(out_auto)

    ref = metric_loss_ref(anc, pos, neg, anc_ideal, pos_ideal, neg_ideal,
                          margin=margin)
    ref = jax.block_until_ready(ref)

    assert jnp.allclose(out, ref, rtol=1e-5, atol=1e-5), (out, ref)
    assert jnp.allclose(out_auto, ref, rtol=1e-5, atol=1e-5), (out_auto, ref)
    print("KERNEL_OK")
</pallas_src>

<mosaic_0001>
module attributes {stable_mosaic.version = 11 : i64} {
  func.func @_metric_loss_kernel(%arg0: i32, %arg1: memref<8x128xf32, #tpu.memory_space<vmem>>, %arg2: memref<8x128xf32, #tpu.memory_space<vmem>>, %arg3: memref<8x128xf32, #tpu.memory_space<vmem>>, %arg4: memref<8x128xf32, #tpu.memory_space<vmem>>, %arg5: memref<8x128xf32, #tpu.memory_space<vmem>>, %arg6: memref<8x128xf32, #tpu.memory_space<vmem>>, %arg7: memref<8x1xf32, #tpu.memory_space<vmem>>) attributes {dimension_semantics = [#tpu.dimension_semantics<parallel>], iteration_bounds = array<i64: 3>, scalar_prefetch = 0 : i64, scratch_operands = 0 : i64, tpu.core_type = #tpu.core_type<tc>, window_params = [{transform_indices = @transform_0, window_bounds = array<i64: 8, 128>}, {transform_indices = @transform_1, window_bounds = array<i64: 8, 128>}, {transform_indices = @transform_2, window_bounds = array<i64: 8, 128>}, {transform_indices = @transform_3, window_bounds = array<i64: 8, 128>}, {transform_indices = @transform_4, window_bounds = array<i64: 8, 128>}, {transform_indices = @transform_5, window_bounds = array<i64: 8, 128>}, {transform_indices = @transform_6, window_bounds = array<i64: 8, 1>}]} {
    %c0 = arith.constant 0 : index
    %c0_0 = arith.constant 0 : index
    %0 = vector.load %arg1[%c0, %c0_0] : memref<8x128xf32, #tpu.memory_space<vmem>>, vector<8x128xf32>
    %c0_1 = arith.constant 0 : index
    %c0_2 = arith.constant 0 : index
    %1 = vector.load %arg3[%c0_1, %c0_2] : memref<8x128xf32, #tpu.memory_space<vmem>>, vector<8x128xf32>
    %2 = arith.subf %0, %1 : vector<8x128xf32>
    %cst = arith.constant 9.99999997E-7 : f32
    %3 = vector.broadcast %cst : f32 to vector<8x128xf32>
    %4 = arith.addf %2, %3 : vector<8x128xf32>
    %5 = arith.mulf %4, %4 : vector<8x128xf32>
    %cst_3 = arith.constant dense<0.000000e+00> : vector<8xf32>
    %6 = vector.multi_reduction <add>, %5, %cst_3 [1] : vector<8x128xf32> to vector<8xf32>
    %7 = vector.shape_cast %6 : vector<8xf32> to vector<8x1xf32>
    %8 = math.sqrt %7 : vector<8x1xf32>
    %c0_4 = arith.constant 0 : index
    %c0_5 = arith.constant 0 : index
    %9 = vector.load %arg1[%c0_4, %c0_5] : memref<8x128xf32, #tpu.memory_space<vmem>>, vector<8x128xf32>
    %c0_6 = arith.constant 0 : index
    %c0_7 = arith.constant 0 : index
    %10 = vector.load %arg2[%c0_6, %c0_7] : memref<8x128xf32, #tpu.memory_space<vmem>>, vector<8x128xf32>
    %11 = arith.subf %9, %10 : vector<8x128xf32>
    %cst_8 = arith.constant 9.99999997E-7 : f32
    %12 = vector.broadcast %cst_8 : f32 to vector<8x128xf32>
    %13 = arith.addf %11, %12 : vector<8x128xf32>
    %14 = arith.mulf %13, %13 : vector<8x128xf32>
    %cst_9 = arith.constant dense<0.000000e+00> : vector<8xf32>
    %15 = vector.multi_reduction <add>, %14, %cst_9 [1] : vector<8x128xf32> to vector<8xf32>
    %16 = vector.shape_cast %15 : vector<8xf32> to vector<8x1xf32>
    %17 = math.sqrt %16 : vector<8x1xf32>
    %c0_10 = arith.constant 0 : index
    %c0_11 = arith.constant 0 : index
    %18 = vector.load %arg1[%c0_10, %c0_11] : memref<8x128xf32, #tpu.memory_space<vmem>>, vector<8x128xf32>
    %c0_12 = arith.constant 0 : index
    %c0_13 = arith.constant 0 : index
    %19 = vector.load %arg4[%c0_12, %c0_13] : memref<8x128xf32, #tpu.memory_space<vmem>>, vector<8x128xf32>
    %20 = arith.subf %18, %19 : vector<8x128xf32>
    %cst_14 = arith.constant 9.99999997E-7 : f32
    %21 = vector.broadcast %cst_14 : f32 to vector<8x128xf32>
    %22 = arith.addf %20, %21 : vector<8x128xf32>
    %23 = arith.mulf %22, %22 : vector<8x128xf32>
    %cst_15 = arith.constant dense<0.000000e+00> : vector<8xf32>
    %24 = vector.multi_reduction <add>, %23, %cst_15 [1] : vector<8x128xf32> to vector<8xf32>
    %25 = vector.shape_cast %24 : vector<8xf32> to vector<8x1xf32>
    %26 = math.sqrt %25 : vector<8x1xf32>
    %c0_16 = arith.constant 0 : index
    %c0_17 = arith.constant 0 : index
    %27 = vector.load %arg2[%c0_16, %c0_17] : memref<8x128xf32, #tpu.memory_space<vmem>>, vector<8x128xf32>
    %c0_18 = arith.constant 0 : index
    %c0_19 = arith.constant 0 : index
    %28 = vector.load %arg5[%c0_18, %c0_19] : memref<8x128xf32, #tpu.memory_space<vmem>>, vector<8x128xf32>
    %29 = arith.subf %27, %28 : vector<8x128xf32>
    %cst_20 = arith.constant 9.99999997E-7 : f32
    %30 = vector.broadcast %cst_20 : f32 to vector<8x128xf32>
    %31 = arith.addf %29, %30 : vector<8x128xf32>
    %32 = arith.mulf %31, %31 : vector<8x128xf32>
    %cst_21 = arith.constant dense<0.000000e+00> : vector<8xf32>
    %33 = vector.multi_reduction <add>, %32, %cst_21 [1] : vector<8x128xf32> to vector<8xf32>
    %34 = vector.shape_cast %33 : vector<8xf32> to vector<8x1xf32>
    %35 = math.sqrt %34 : vector<8x1xf32>
    %c0_22 = arith.constant 0 : index
    %c0_23 = arith.constant 0 : index
    %36 = vector.load %arg3[%c0_22, %c0_23] : memref<8x128xf32, #tpu.memory_space<vmem>>, vector<8x128xf32>
    %c0_24 = arith.constant 0 : index
    %c0_25 = arith.constant 0 : index
    %37 = vector.load %arg6[%c0_24, %c0_25] : memref<8x128xf32, #tpu.memory_space<vmem>>, vector<8x128xf32>
    %38 = arith.subf %36, %37 : vector<8x128xf32>
    %cst_26 = arith.constant 9.99999997E-7 : f32
    %39 = vector.broadcast %cst_26 : f32 to vector<8x128xf32>
    %40 = arith.addf %38, %39 : vector<8x128xf32>
    %41 = arith.mulf %40, %40 : vector<8x128xf32>
    %cst_27 = arith.constant dense<0.000000e+00> : vector<8xf32>
    %42 = vector.multi_reduction <add>, %41, %cst_27 [1] : vector<8x128xf32> to vector<8xf32>
    %43 = vector.shape_cast %42 : vector<8xf32> to vector<8x1xf32>
    %44 = math.sqrt %43 : vector<8x1xf32>
    %45 = arith.subf %17, %8 : vector<8x1xf32>
    %cst_28 = arith.constant 1.000000e+00 : f32
    %46 = vector.broadcast %cst_28 : f32 to vector<8x1xf32>
    %47 = arith.addf %45, %46 : vector<8x1xf32>
    %cst_29 = arith.constant 0.000000e+00 : f32
    %48 = vector.broadcast %cst_29 : f32 to vector<8x1xf32>
    %49 = arith.maximumf %47, %48 : vector<8x1xf32>
    %50 = math.absf %47 : vector<8x1xf32>
    %cst_30 = arith.constant 0.000000e+00 : f32
    %51 = vector.broadcast %cst_30 : f32 to vector<8x1xf32>
    %52 = arith.subf %51, %50 : vector<8x1xf32>
    %53 = math.exp %52 : vector<8x1xf32>
    %54 = math.log1p %53 : vector<8x1xf32>
    %55 = arith.addf %49, %54 : vector<8x1xf32>
    %cst_31 = arith.constant 1.000000e-01 : f32
    %56 = vector.broadcast %cst_31 : f32 to vector<8x1xf32>
    %57 = arith.mulf %56, %17 : vector<8x1xf32>
    %cst_32 = arith.constant 1.000000e+00 : f32
    %58 = vector.broadcast %cst_32 : f32 to vector<8x1xf32>
    %59 = arith.mulf %58, %55 : vector<8x1xf32>
    %60 = arith.addf %26, %35 : vector<8x1xf32>
    %61 = arith.addf %60, %44 : vector<8x1xf32>
    %cst_33 = arith.constant 1.000000e+00 : f32
    %62 = vector.broadcast %cst_33 : f32 to vector<8x1xf32>
    %63 = arith.mulf %62, %61 : vector<8x1xf32>
    %cst_34 = arith.constant 3.000000e+00 : f32
    %64 = vector.broadcast %cst_34 : f32 to vector<8x1xf32>
    %65 = arith.divf %63, %64 : vector<8x1xf32>
    %66 = arith.mulf %57, %57 : vector<8x1xf32>
    %67 = arith.mulf %59, %59 : vector<8x1xf32>
    %68 = arith.addf %66, %67 : vector<8x1xf32>
    %69 = arith.mulf %65, %65 : vector<8x1xf32>
    %70 = arith.addf %68, %69 : vector<8x1xf32>
    %c8_i32 = arith.constant 8 : i32
    %71 = arith.muli %arg0, %c8_i32 : i32
    %72 = tpu.iota {dimensions = array<i32: 0>} : vector<8x1xi32>
    %73 = vector.broadcast %71 : i32 to vector<8x1xi32>
    %74 = arith.addi %73, %72 : vector<8x1xi32>
    %c20_i32 = arith.constant 20 : i32
    %75 = vector.broadcast %c20_i32 : i32 to vector<8x1xi32>
    %76 = arith.cmpi slt, %74, %75 : vector<8x1xi32>
    %cst_35 = arith.constant 0.000000e+00 : f32
    %77 = vector.broadcast %cst_35 : f32 to vector<8x1xf32>
    %78 = arith.select %76, %70, %77 : vector<8x1xi1>, vector<8x1xf32>
    %c0_36 = arith.constant 0 : index
    %c0_37 = arith.constant 0 : index
    %79 = vector.load %arg7[%c0_36, %c0_37] : memref<8x1xf32, #tpu.memory_space<vmem>>, vector<8x1xf32>
    tpu.vector_store %arg7[%c0_36, %c0_37], %78 {strides = array<i32>} : memref<8x1xf32, #tpu.memory_space<vmem>>, vector<8x1xf32>,
    return
  }
  func.func @transform_0(%arg0: i32) -> (i32, i32) {
    %c0_i32 = arith.constant 0 : i32
    %c0_i32_0 = arith.constant 0 : i32
    return %arg0, %c0_i32 : i32, i32
  }
  func.func @transform_1(%arg0: i32) -> (i32, i32) {
    %c0_i32 = arith.constant 0 : i32
    %c0_i32_0 = arith.constant 0 : i32
    return %arg0, %c0_i32 : i32, i32
  }
  func.func @transform_2(%arg0: i32) -> (i32, i32) {
    %c0_i32 = arith.constant 0 : i32
    %c0_i32_0 = arith.constant 0 : i32
    return %arg0, %c0_i32 : i32, i32
  }
  func.func @transform_3(%arg0: i32) -> (i32, i32) {
    %c0_i32 = arith.constant 0 : i32
    %c0_i32_0 = arith.constant 0 : i32
    return %arg0, %c0_i32 : i32, i32
  }
  func.func @transform_4(%arg0: i32) -> (i32, i32) {
    %c0_i32 = arith.constant 0 : i32
    %c0_i32_0 = arith.constant 0 : i32
    return %arg0, %c0_i32 : i32, i32
  }
  func.func @transform_5(%arg0: i32) -> (i32, i32) {
    %c0_i32 = arith.constant 0 : i32
    %c0_i32_0 = arith.constant 0 : i32
    return %arg0, %c0_i32 : i32, i32
  }
  func.func @transform_6(%arg0: i32) -> (i32, i32) {
    %c0_i32 = arith.constant 0 : i32
    %c0_i32_0 = arith.constant 0 : i32
    return %arg0, %c0_i32 : i32, i32
  }
}

</mosaic_0001>

<bundles_post_ra>
// kernel: tpu_custom_call.1
= control target key start
LH: loop header
LB: loop body
LE: loop exit
PB: predicated region body
PF: predicated region fallthrough
CT: control target
= control target key end

     0   :  { %s1372_s0 = inlined_call_operand.hbm [shape: f32[20,128], index: 0, kind: input, shape index: {}]   ;;  %s1373_s1 = inlined_call_operand.hbm [shape: f32[20,128], index: 1, kind: input, shape index: {}]   ;;  %s1374_s2 = inlined_call_operand.hbm [shape: f32[20,128], index: 2, kind: input, shape index: {}]   ;;  %s1375_s3 = inlined_call_operand.hbm [shape: f32[20,128], index: 3, kind: input, shape index: {}]   ;;  %s1376_s4 = inlined_call_operand.hbm [shape: f32[20,128], index: 4, kind: input, shape index: {}]   ;;  %s1377_s5 = inlined_call_operand.hbm [shape: f32[20,128], index: 5, kind: input, shape index: {}]   ;;  %s1378_s6 = inlined_call_operand.vmem [shape: f32[20,1], index: 6, kind: output, shape index: {}]  }
   0x1   :  { %1380 = sst [smem:[#allocation18_spill]] %s1373_s1 }
   0x2   :  { %1381 = sst [smem:[#allocation19_spill]] %s1375_s3 }
   0x3   :  { %11 = vsyncpa [#allocation3], 0 }
   0x4   :  { %13 = vsyncpa [#allocation3 + $0x1], 0 }
   0x5   :  { %14 = vsyncpa [#allocation5], 0 }
   0x6   :  { %16 = vsyncpa [#allocation5 + $0x1], 0 }
   0x7   :  { %17 = vsyncpa [#allocation8], 0 }
   0x8   :  { %19 = vsyncpa [#allocation8 + $0x1], 0 }
   0x9   :  { %20 = vsyncpa [#allocation11], 0 }
   0xa   :  { %22 = vsyncpa [#allocation11 + $0x1], 0  ;;  %s1136_s21 = smov 0   ;;  %s1138_s22 = smov 0  }
   0xb   :  { %s1140_s23 = smov 0   ;;  %s1142_s24 = smov 0  }
   0xc LB: > { %1382 = sst [smem:[#allocation16_spill]] %s1094_s23  ;;  %s1155_s25 = sadd.s32 4294967295, %s1098_s24   ;;  %s1098_s24 = sphi %s1142_s24, %s1394_s24   ;;  %s1094_s23 = sphi %s1140_s23, %s1391_s23   ;;  %s1090_s22 = sphi %s1138_s22, %s1393_s22   ;;  %s1086_s21 = sphi %s1136_s21, %s1392_s21  }
   0xd   : > { %s1158_s26 = sadd.s32 1, %s1098_s24   ;;  %s35_s28 = sadd.s32 1, %s1094_s23 }
   0xe   : > { %s32_s27 = ssub.s32 %s1098_s24, %s1158_s26  ;;  %p42_p1 = scmp.ne.s32.totalorder %s1094_s23, %s1090_s22 }
   0xf   : > { %p33_p0 = scmp.eq.s32.totalorder %s32_s27, 0  ;;  %p43_p2 = scmp.eq.s32.totalorder %s1098_s24, 0 }
  0x10   : > { %p48_p3 = scmp.ne.s32.totalorder %s1090_s22, %s1086_s21  ;;  %p49_p5 = scmp.eq.s32.totalorder %s1155_s25, 0 }
  0x11   : > { %s1168_s29 = scalar_select %p33_p0, %s1094_s23, %s35_s28  }
  0x12   : > { %p44_p4 = por %p43_p2, %p42_p1  ;;  %p822_p6 = scmp.lt.s32.totalorder %s1098_s24, 3 }
  0x13   : > { %1383 = sst [smem:[#allocation17_spill]] %s1168_s29  ;;  %p1172_p7 = por %p49_p5, %p48_p3 }
  0x14   : > { %s1177_s7 = sand.u32 1, %s1094_s23   ;;  %s1183_s9 = sshll.u32 %s1098_s24, 3 }
  0x15   : > { %s1180_s8 = sshll.u32 %s1177_s7, 3  ;;  %p1185_p8 = pnand %p822_p6, %p44_p4 }
  0x16   : > { %s247_s11 = sand.u32 1, %s1098_s24   ;;  %s1386_s1 = sld [smem:[#allocation18_spill]] }
  0x17   : > { %s251_s16 = scalar_lea.vmem [#allocation4], %s1180_s8  ;;  %s1197_s18 = scalar_lea.sflag [#allocation5], %s247_s11 }
  0x18   : > { %s259_s17 = sshll.u32 %s251_s16, 4  ;;  %p1201_p10 = pneg %p1185_p8  ;;  %s260_s17 = int_to_ptr.vmem [resolvable:$true] %s259_s17 }
  0x1c   : > { %s255_s14 = scalar_lea.hbm %s1386_s1, %s1183_s9  ;;  %s879_s12 = scalar_lea.hbm %s1386_s1, 24 }
  0x1d   : > { %s257_s15 = sshll.u32 %s255_s14, 4  ;;  %s258_s15 = int_to_ptr.hbm [resolvable:$true] %s257_s15 }
  0x1e   : > { %s872_s19 = sshra.s32 %s258_s15, 4  ;;  %s873_s19 = int_to_ptr.hbm [resolvable:$true] %s872_s19 }
  0x1f   : > { %s874_s20 = scalar_lea.hbm %s873_s19, 8  ;;  %p880_p13 = scmp.lt.s32.totalorder %s873_s19, %s1386_s1 }
  0x20   : > { %p875_p9 = scmp.ne.s32.totalorder %s873_s19, %s874_s20  ;;  %p881_p0 = scmp.lt.s32.totalorder %s879_s12, %s874_s20 }
  0x22   : > { %p877_p11 = pnand %p1201_p10, %p875_p9  ;;  %p882_p1 = por %p881_p0, %p880_p13 }
  0x24   : > { %p878_p12 = pneg %p877_p11 }
  0x26   : > { %p883_p2 = pnand %p882_p1, %p878_p12 }
  0x28   : > { %886 = shalt.err (!%p883_p2)
}
  0x29   : > { %809 = dma.hbm_to_vmem [thread:$0]  (!%p1185_p8), %s258_s15, 128, %s260_s17, %s1197_s18  }
  0x2a   : > { %p780_p3 = scmp.ge.s32.totalorder %s1098_s24, 1  ;;  %p340_p4 = scmp.lt.s32.totalorder %s1098_s24, 4 }
  0x2b   : > { %s1389_s3 = sld [smem:[#allocation19_spill]]  ;;  %s289_s12 = scalar_lea.vmem [#allocation7], %s1180_s8 }
  0x2c   : > { %p1218_p5 = pnand %p780_p3, %p340_p4  ;;  %s297_s13 = sshll.u32 %s289_s12, 4  ;;  %s298_s13 = int_to_ptr.vmem [resolvable:$true] %s297_s13 }
  0x2d   : > { %s1229_s14 = scalar_lea.sflag [#allocation8], %s247_s11 }
  0x31   : > { %s293_s27 = scalar_lea.hbm %s1389_s3, %s1183_s9  ;;  %s909_s19 = scalar_lea.hbm %s1389_s3, 24 }
  0x32   : > { %s295_s28 = sshll.u32 %s293_s27, 4  ;;  %s296_s28 = int_to_ptr.hbm [resolvable:$true] %s295_s28 }
  0x33   : > { %s902_s1 = sshra.s32 %s296_s28, 4  ;;  %s903_s1 = int_to_ptr.hbm [resolvable:$true] %s902_s1 }
  0x34   : > { %s904_s15 = scalar_lea.hbm %s903_s1, 8  ;;  %p910_p12 = scmp.lt.s32.totalorder %s903_s1, %s1389_s3 }
  0x35   : > { %p905_p6 = scmp.ne.s32.totalorder %s903_s1, %s904_s15  ;;  %p911_p13 = scmp.lt.s32.totalorder %s909_s19, %s904_s15 }
  0x37   : > { %p907_p9 = pnand %p905_p6, %p1201_p10  ;;  %p912_p0 = por %p911_p13, %p910_p12 }
  0x39   : > { %p908_p11 = pneg %p907_p9 }
  0x3b   : > { %p913_p1 = pnand %p912_p0, %p908_p11 }
  0x3d   : > { %916 = shalt.err (!%p913_p1)
}
  0x3e   : > { %815 = dma.hbm_to_vmem [thread:$0]  (!%p1185_p8), %s296_s28, 128, %s298_s13, %s1229_s14  }
  0x3f   : > { %s236_s29 = scalar_lea.hbm %s1372_s0, %s1183_s9  ;;  %s232_s12 = scalar_lea.vmem [#allocation2], %s1180_s8 }
  0x40   : > { %s240_s17 = sshll.u32 %s232_s12, 4  ;;  %s238_s20 = sshll.u32 %s236_s29, 4  ;;  %s241_s17 = int_to_ptr.vmem [resolvable:$true] %s240_s17  ;;  %s239_s20 = int_to_ptr.hbm [resolvable:$true] %s238_s20 }
  0x41   : > { %s229_s1 = scalar_lea.sflag [#allocation3], %s1177_s7  ;;  %s932_s15 = sshra.s32 %s239_s20, 4  ;;  %s933_s15 = int_to_ptr.hbm [resolvable:$true] %s932_s15 }
  0x42   : > { %s934_s19 = scalar_lea.hbm %s933_s15, 8  ;;  %s939_s28 = scalar_lea.hbm %s1372_s0, 24 }
  0x43   : > { %p935_p2 = scmp.ne.s32.totalorder %s933_s15, %s934_s19  ;;  %p940_p6 = scmp.lt.s32.totalorder %s933_s15, %s1372_s0 }
  0x44   : > { %p941_p9 = scmp.lt.s32.totalorder %s939_s28, %s934_s19 }
  0x45   : > { %p937_p3 = pnand %p935_p2, %p1201_p10 }
  0x46   : > { %p942_p11 = por %p941_p9, %p940_p6 }
  0x47   : > { %p938_p4 = pneg %p937_p3 }
  0x49   : > { %p943_p12 = pnand %p942_p11, %p938_p4 }
  0x4b   : > { %946 = shalt.err (!%p943_p12)
}
  0x4c   : > { %806 = dma.hbm_to_vmem [thread:$0]  (!%p1185_p8), %s239_s20, 128, %s241_s17, %s229_s1  }
  0x4d   : > { %s274_s12 = scalar_lea.hbm %s1374_s2, %s1183_s9  ;;  %s270_s3 = scalar_lea.vmem [#allocation6], %s1180_s8 }
  0x4e   : > { %s278_s27 = sshll.u32 %s270_s3, 4  ;;  %s276_s23 = sshll.u32 %s274_s12, 4  ;;  %s279_s27 = int_to_ptr.vmem [resolvable:$true] %s278_s27  ;;  %s277_s23 = int_to_ptr.hbm [resolvable:$true] %s276_s23 }
  0x4f   : > { %s962_s15 = sshra.s32 %s277_s23, 4  ;;  %s969_s17 = scalar_lea.hbm %s1374_s2, 24  ;;  %s963_s15 = int_to_ptr.hbm [resolvable:$true] %s962_s15 }
  0x50   : > { %s964_s19 = scalar_lea.hbm %s963_s15, 8  ;;  %p970_p2 = scmp.lt.s32.totalorder %s963_s15, %s1374_s2 }
  0x51   : > { %p965_p13 = scmp.ne.s32.totalorder %s963_s15, %s964_s19  ;;  %p971_p3 = scmp.lt.s32.totalorder %s969_s17, %s964_s19 }
  0x53   : > { %p967_p0 = pnand %p965_p13, %p1201_p10  ;;  %p972_p4 = por %p971_p3, %p970_p2 }
  0x55   : > { %p968_p1 = pneg %p967_p0 }
  0x57   : > { %p973_p6 = pnand %p972_p4, %p968_p1 }
  0x59   : > { %976 = shalt.err (!%p973_p6)
}
  0x5a   : > { %812 = dma.hbm_to_vmem [thread:$0]  (!%p1185_p8), %s277_s23, 128, %s279_s27, %s1197_s18  }
  0x5b   : > { %s312_s29 = scalar_lea.hbm %s1376_s4, %s1183_s9  ;;  %s308_s12 = scalar_lea.vmem [#allocation9], %s1180_s8 }
  0x5c   : > { %s316_s3 = sshll.u32 %s308_s12, 4  ;;  %s314_s28 = sshll.u32 %s312_s29, 4  ;;  %s317_s3 = int_to_ptr.vmem [resolvable:$true] %s316_s3  ;;  %s315_s28 = int_to_ptr.hbm [resolvable:$true] %s314_s28 }
  0x5d   : > { %s992_s15 = sshra.s32 %s315_s28, 4  ;;  %s999_s23 = scalar_lea.hbm %s1376_s4, 24  ;;  %s993_s15 = int_to_ptr.hbm [resolvable:$true] %s992_s15 }
  0x5e   : > { %s994_s19 = scalar_lea.hbm %s993_s15, 8  ;;  %p1000_p13 = scmp.lt.s32.totalorder %s993_s15, %s1376_s4 }
  0x5f   : > { %p995_p9 = scmp.ne.s32.totalorder %s993_s15, %s994_s19  ;;  %p1001_p0 = scmp.lt.s32.totalorder %s999_s23, %s994_s19 }
  0x61   : > { %p997_p11 = pnand %p995_p9, %p1201_p10  ;;  %p1002_p1 = por %p1001_p0, %p1000_p13 }
  0x63   : > { %p998_p12 = pneg %p997_p11 }
  0x65   : > { %p1003_p2 = pnand %p1002_p1, %p998_p12 }
  0x67   : > { %1006 = shalt.err (!%p1003_p2)
}
  0x68   : > { %818 = dma.hbm_to_vmem [thread:$0]  (!%p1185_p8), %s315_s28, 128, %s317_s3, %s1229_s14  }
  0x69   : > { %s331_s24 = scalar_lea.hbm %s1377_s5, %s1183_s9  ;;  %s327_s29 = scalar_lea.vmem [#allocation10], %s1180_s8 }
  0x6a   : > { %s333_s11 = sshll.u32 %s331_s24, 4  ;;  %s335_s12 = sshll.u32 %s327_s29, 4  ;;  %s334_s11 = int_to_ptr.hbm [resolvable:$true] %s333_s11  ;;  %s336_s12 = int_to_ptr.vmem [resolvable:$true] %s335_s12 }
  0x6b   : > { %s324_s15 = scalar_lea.sflag [#allocation11], %s1177_s7  ;;  %s1022_s19 = sshra.s32 %s334_s11, 4  ;;  %s1023_s19 = int_to_ptr.hbm [resolvable:$true] %s1022_s19 }
  0x6c   : > { %s1024_s13 = scalar_lea.hbm %s1023_s19, 8  ;;  %s1029_s14 = scalar_lea.hbm %s1377_s5, 24 }
  0x6d   : > { %p1025_p3 = scmp.ne.s32.totalorder %s1023_s19, %s1024_s13  ;;  %p1030_p9 = scmp.lt.s32.totalorder %s1023_s19, %s1377_s5 }
  0x6e   : > { %p1031_p11 = scmp.lt.s32.totalorder %s1029_s14, %s1024_s13 }
  0x6f   : > { %p1027_p4 = pnand %p1025_p3, %p1201_p10 }
  0x70   : > { %p1032_p12 = por %p1031_p11, %p1030_p9 }
  0x71   : > { %p1028_p6 = pneg %p1027_p4 }
  0x73   : > { %p1033_p13 = pnand %p1032_p12, %p1028_p6 }
  0x75   : > { %1036 = shalt.err (!%p1033_p13)
}
  0x76   : > { %821 = dma.hbm_to_vmem [thread:$0]  (!%p1185_p8), %s334_s11, 128, %s336_s12, %s324_s15  }
  0x77   : > { %344 = sbr.rel (%p1218_p5) target bundleno = 326 (0x146), region = 44  ;;  %s346_s7 = sand.u32 (!%p1218_p5), 1, %s1090_s22  }
  0x78   : > { %s781_s8 = sshll.u32 (!%p1218_p5), %s346_s7, 3  ;;  %s347_s9 = scalar_lea.sflag (!%p1218_p5), [#allocation3], %s346_s7 }
  0x79   : > { %s350_s21 = scalar_lea.vmem (!%p1218_p5), [#allocation2], %s781_s8 }
  0x7c   : > { %1069 = dma.done.wait (%p1172_p7), %s347_s9, 128  }
  0x7d   : > { %1071 = vsyncadd (%p1172_p7), %s347_s9, 4294967168  ;;  %s356_s18 = sand.u32 1, %s1155_s25   ;;  %s360_s10 = scalar_lea.vmem [#allocation4], %s781_s8 }
  0x7e   : > { %s357_s27 = scalar_lea.sflag [#allocation5], %s356_s18 }
  0x7f   : > { %1073 = dma.done.wait (%p1172_p7), %s357_s27, 256  }
  0x80   : > { %1075 = vsyncadd (%p1172_p7), %s357_s27, 4294967040  ;;  %s370_s16 = scalar_lea.vmem [#allocation6], %s781_s8  ;;  %s377_s20 = scalar_lea.sflag [#allocation8], %s356_s18 }
  0x81   : > { %s380_s1 = scalar_lea.vmem [#allocation7], %s781_s8 }
  0x82   : > { %1077 = dma.done.wait (%p1172_p7), %s377_s20, 256  }
  0x83   : > { %1079 = vsyncadd (%p1172_p7), %s377_s20, 4294967040  ;;  %s390_s24 = scalar_lea.vmem [#allocation9], %s781_s8  ;;  %s397_s11 = scalar_lea.sflag [#allocation11], %s346_s7 }
  0x84   : > { %s400_s29 = scalar_lea.vmem [#allocation10], %s781_s8 }
  0x85   : > { %1081 = dma.done.wait (%p1172_p7), %s397_s11, 128  }
  0x86   : > { %1083 = vsyncadd (%p1172_p7), %s397_s11, 4294967168  ;;  %v458_v0 = vld [vmem:[%s350_s21] sm:$0xff]  ;;  %v495_v1 = vld [vmem:[%s380_s1] sm:$0xff]  ;;  %v1100_v58 = vmov 3.0   ;;  %p454_p7 = scmp.lt.s32.totalorder %s1155_s25, 2  ;;  %s788_s30 = sshll.u32 %s1155_s25, 3 }
  0x87   : > { %v459_v2 = vld [vmem:[%s370_s16] sm:$0xff]  ;;  %v496_v3 = vsub.f32 %v458_v0, %v495_v1  ;;  %v477_v5 = vld [vmem:[%s360_s10] sm:$0xff]  ;;  %vm589_vm13 = vcmask 7168  }
  0x88   : > { %v460_v4 = vsub.f32 %v458_v0, %v459_v2  ;;  %v513_v6 = vld [vmem:[%s390_s24] sm:$0xff]  ;;  %v531_v7 = vld [vmem:[%s400_s29] sm:$0xff]  ;;  %v478_v12 = vsub.f32 %v458_v0, %v477_v5  ;;  %s1396_s25 = smov (!%p454_p7, %s1155_s25), 2 }
  0x89   : > { %v532_v8 = vsub.f32 %v459_v2, %v531_v7  ;;  %v497_v9 = vadd.f32 1e-06, %v496_v3  ;;  %v514_v11 = vsub.f32 %v477_v5, %v513_v6  ;;  %s787_s12 = sshll.u32 %s1396_s25, 3 }
  0x8a   : > { %v461_v10 = vadd.f32 1e-06, %v460_v4  ;;  %v479_v18 = vadd.f32 1e-06, %v478_v12  ;;  %s457_s13 = scalar_lea.vmem %s1378_s6, %s787_s12 }
  0x8b   : > { %v533_v13 = vadd.f32 1e-06, %v532_v8  ;;  %v498_v14 = vmul.f32 %v497_v9, %v497_v9  ;;  %v515_v17 = vadd.f32 1e-06, %v514_v11 }
  0x8c   : > { %v462_v15 = vmul.f32 %v461_v10, %v461_v10  ;;  %v480_v20 = vmul.f32 %v479_v18, %v479_v18 }
  0x8d   : > { %v534_v16 = vmul.f32 %v533_v13, %v533_v13  ;;  %499 = vadd.xlane.f32.xlu1 %v498_v14  ;;  %v516_v19 = vmul.f32 %v515_v17, %v515_v17 }
  0x8e   : > { %463 = vadd.xlane.f32.xlu0 %v462_v15 }
  0x8f   : > { %535 = vadd.xlane.f32.xlu2 %v534_v16 }
  0x95   : > { %517 = vadd.xlane.f32.xlu1 %v516_v19 }
  0x96   : > { %481 = vadd.xlane.f32.xlu0 %v480_v20 }
 0x100   : > { %v1326_v21 = vpop.xlane.xlu1 %499 }
 0x101   : > { %v464_v22 = vpop.xlane.xlu0 %463  ;;  %vm508_vm4 = vcmp.eq.f32.partialorder %v1326_v21, inf  ;;  %vm510_vm6 = vcmp.eq.f32.partialorder %v1326_v21, 0.0  ;;  %v511_v11 = vand.u32 2147483648, %v1326_v21 }
 0x102   : > { %856 = vrsqrt.f32 %v464_v22  ;;  %v1332_v29 = vpop.xlane.xlu2 %535  ;;  %vm472_vm0 = vcmp.eq.f32.partialorder %v464_v22, inf  ;;  %v475_v49 = vand.u32 2147483648, %v464_v22  ;;  %vm474_vm2 = vcmp.eq.f32.partialorder %v464_v22, 0.0 }
 0x103   : > { %vm544_vm8 = vcmp.eq.f32.partialorder %v1332_v29, inf  ;;  %vm546_vm9 = vcmp.eq.f32.partialorder %v1332_v29, 0.0 }
 0x108   : > { %v857_v23 = vpop.eup %856  ;;  %v1328_v26 = vpop.xlane.xlu1 %517 }
 0x109   : > { %v482_v24 = vpop.xlane.xlu0 %481  ;;  %v466_v25 = vmul.f32 %v857_v23, %v464_v22  ;;  %vm526_vm5 = vcmp.eq.f32.partialorder %v1328_v26, inf  ;;  %v529_v12 = vand.u32 2147483648, %v1328_v26  ;;  %vm528_vm7 = vcmp.eq.f32.partialorder %v1328_v26, 0.0 }
 0x10a   : > { %858 = vrsqrt.f32 %v482_v24  ;;  %vm490_vm1 = vcmp.eq.f32.partialorder %v482_v24, inf  ;;  %v493_v50 = vand.u32 2147483648, %v482_v24  ;;  %vm492_vm3 = vcmp.eq.f32.partialorder %v482_v24, 0.0 }
 0x10b   : > { %v467_v27 = vmul.f32 %v857_v23, %v466_v25  ;;  %860 = vrsqrt.f32 %v1326_v21 }
 0x10c   : > { %862 = vrsqrt.f32 %v1328_v26 }
 0x10d   : > { %v468_v28 = vmul.f32 0.5, %v467_v27  ;;  %864 = vrsqrt.f32 %v1332_v29  ;;  %v583_v27 = vlaneseq }
 0x10e   : > { %866 = vrcp.f32 %v1100_v58 }
 0x10f   : > { %v469_v30 = vsub.f32 1.5, %v468_v28 }
 0x110   : > { %v859_v31 = vpop.eup %858 }
 0x111   : > { %v484_v32 = vmul.f32 %v859_v31, %v482_v24  ;;  %v861_v33 = vpop.eup %860  ;;  %v470_v35 = vmul.f32 %v857_v23, %v469_v30  ;;  %v547_v23 = vand.u32 2147483648, %v1332_v29 }
 0x112   : > { %v863_v34 = vpop.eup %862  ;;  %v502_v37 = vmul.f32 %v861_v33, %v1326_v21 }
 0x113   : > { %v485_v36 = vmul.f32 %v859_v31, %v484_v32  ;;  %v520_v39 = vmul.f32 %v863_v34, %v1328_v26  ;;  %v865_v40 = vpop.eup %864  ;;  %v471_v41 = vmul.f32 %v470_v35, %v464_v22 }
 0x114   : > { %v503_v43 = vmul.f32 %v861_v33, %v502_v37  ;;  %v538_v46 = vmul.f32 %v865_v40, %v1332_v29  ;;  %v867_v0 = vpop.eup %866 }
 0x115   : > { %v486_v38 = vmul.f32 0.5, %v485_v36  ;;  %v521_v45 = vmul.f32 %v863_v34, %v520_v39  ;;  %v473_v47 = vsel %vm472_vm0, %v464_v22, %v471_v41  ;;  %v570_v6 = vmul.f32 3.0, %v867_v0 }
 0x116   : > { %v504_v51 = vmul.f32 0.5, %v503_v43  ;;  %v476_v54 = vsel %vm474_vm2, %v475_v49, %v473_v47  ;;  %v539_v56 = vmul.f32 %v865_v40, %v538_v46  ;;  %vm574_vm10 = vweird.f32 %v867_v0 }
 0x117   : > { %v487_v42 = vsub.f32 1.5, %v486_v38  ;;  %v522_v53 = vmul.f32 0.5, %v521_v45  ;;  %v571_v10 = vsub.f32 1.0, %v570_v6  ;;  %v584_v36 = vshrl.u32 %v583_v27, 7 }
 0x118   : > { %v505_v60 = vsub.f32 1.5, %v504_v51  ;;  %v540_v62 = vmul.f32 0.5, %v539_v56 }
 0x119   : > { %v488_v44 = vmul.f32 %v859_v31, %v487_v42  ;;  %v523_v61 = vsub.f32 1.5, %v522_v53  ;;  %v572_v18 = vmul.f32 %v867_v0, %v571_v10 }
 0x11a   : > { %v506_v2 = vmul.f32 %v861_v33, %v505_v60  ;;  %v541_v4 = vsub.f32 1.5, %v540_v62 }
 0x11b   : > { %v489_v48 = vmul.f32 %v488_v44, %v482_v24  ;;  %v524_v3 = vmul.f32 %v863_v34, %v523_v61 }
 0x11c   : > { %v507_v7 = vmul.f32 %v506_v2, %v1326_v21  ;;  %v542_v9 = vmul.f32 %v865_v40, %v541_v4 }
 0x11d   : > { %v491_v52 = vsel %vm490_vm1, %v482_v24, %v489_v48  ;;  %v525_v8 = vmul.f32 %v524_v3, %v1328_v26 }
 0x11e   : > { %v494_v55 = vsel %vm492_vm3, %v493_v50, %v491_v52  ;;  %v509_v13 = vsel %vm508_vm4, %v1326_v21, %v507_v7  ;;  %v543_v15 = vmul.f32 %v542_v9, %v1332_v29 }
 0x11f   : > { %v549_v57 = vsub.f32 %v494_v55, %v476_v54  ;;  %v527_v14 = vsel %vm526_vm5, %v1328_v26, %v525_v8  ;;  %v512_v19 = vsel %vm510_vm6, %v511_v11, %v509_v13  ;;  %v573_v26 = vadd.f32 %v867_v0, %v572_v18 }
 0x120   : > { %v530_v20 = vsel %vm528_vm7, %v529_v12, %v527_v14  ;;  %v545_v21 = vsel %vm544_vm8, %v1332_v29, %v543_v15  ;;  %v566_v38 = vmul.f32 0.1, %v494_v55  ;;  %v585_v29 = vstv %s788_s30 }
 0x121   : > { %v550_v59 = vadd.f32 1.0, %v549_v57  ;;  %v567_v24 = vadd.f32 %v530_v20, %v512_v19  ;;  %v548_v28 = vsel %vm546_vm9, %v547_v23, %v545_v21  ;;  %v575_v35 = vsel %vm574_vm10, %v867_v0, %v573_v26 }
 0x122   : > { %v586_v42 = vadd.s32 %v585_v29, %v584_v36  ;;  %v577_v43 = vmul.f32 %v566_v38, %v566_v38 }
 0x123   : > { %v552_v63 = vand.u32 2147483647, %v550_v59  ;;  %v568_v32 = vadd.f32 %v567_v24, %v548_v28  ;;  %v551_v37 = vmax.f32 %v550_v59, 0.0 }
 0x124   : > { %vm587_vm12 = vcmp.lt.s32.totalorder %v586_v42, 20 }
 0x125   : > { %v553_v1 = vsub.f32 0.0, %v552_v63  ;;  %v576_v41 = vmul.f32 %v575_v35, %v568_v32 }
 0x127   : > { %v554_v5 = vmul.f32 1.442695, %v553_v1  ;;  %v580_v46 = vmul.f32 %v576_v41, %v576_v41 }
 0x129   : > { %868 = vpow2.f32 %v554_v5 }
 0x12f   : > { %v869_v16 = vpop.eup %868 }
 0x130   : > { %v556_v17 = vadd.f32 1.0, %v869_v16  ;;  %v559_v22 = vmul.f32 -0.5, %v869_v16  ;;  %v562_v30 = vand.u32 2147483647, %v869_v16 }
 0x132   : > { %870 = vlog2.f32 %v556_v17  ;;  %v560_v25 = vadd.f32 1.0, %v559_v22  ;;  %vm563_vm11 = vcmp.lt.f32.partialorder %v562_v30, 0.0004427343 }
 0x134   : > { %v561_v34 = vmul.f32 %v869_v16, %v560_v25 }
 0x138   : > { %v871_v31 = vpop.eup %870 }
 0x139   : > { %v558_v33 = vmul.f32 0.6931472, %v871_v31 }
 0x13b   : > { %v564_v39 = vsel %vm563_vm11, %v561_v34, %v558_v33 }
 0x13c   : > { %v565_v40 = vadd.f32 %v564_v39, %v551_v37 }
 0x13e   : > { %v578_v44 = vmul.f32 %v565_v40, %v565_v40 }
 0x140   : > { %v579_v45 = vadd.f32 %v578_v44, %v577_v43 }
 0x142   : > { %v581_v47 = vadd.f32 %v580_v46, %v579_v45 }
 0x144   : > { %v588_v48 = vsel %vm587_vm12, %v581_v47, 0.0 }
 0x145   : > { %590 = vst.msk [vmem:[%s457_s13] sm:$0xff] %vm589_vm13, %v588_v48 }
 0x146 PF: > { %s1390_s17 = sld [smem:[#allocation16_spill]]  ;;  %p25_p8 = scmp.ge.s32.totalorder %s1158_s26, 5  }
 0x147   : > { %s1391_s23 = sld [smem:[#allocation17_spill]]  ;;  %s1392_s21 = smov %s1090_s22 }
 0x148   : > { %s1394_s24 = smov %s1158_s26  ;;  %27 = sbr.rel (!%p25_p8) target bundleno = 12 (0xc), region = 145 }
 0x14c   : > { %s1393_s22 = smov %s1390_s17 }
 0x14d   :  { %610 = vsyncpa [#allocation3], 1 }
 0x14e   :  { %612 = vsyncpa [#allocation3 + $0x1], 1 }
 0x14f   :  { %613 = vsyncpa [#allocation5], 1 }
 0x150   :  { %615 = vsyncpa [#allocation5 + $0x1], 1 }
 0x151   :  { %616 = vsyncpa [#allocation8], 1 }
 0x152   :  { %618 = vsyncpa [#allocation8 + $0x1], 1 }
 0x153   :  { %619 = vsyncpa [#allocation11], 1 }
 0x154   :  { %621 = vsyncpa [#allocation11 + $0x1], 1 }

</bundles_post_ra>
